<compile_context>
chip_gen: v6e
topology: v6e:2x2x1
jax: 0.10.0
libtpu: 0.0.40
codegen_flags: <defaults>
</compile_context>

<pallas_src>
import functools
import numpy as np

import jax
import jax.numpy as jnp
from jax.experimental import pallas as pl
from jax.experimental.pallas import tpu as pltpu


def _round_up(x, m):
    return (x + m - 1) // m * m


def _cdiv(a, b):
    return -(-a // b)


# ----------------------------------------------------------------------------
# Pallas kernel:  out = relu( bias + patches_bf16 @ W_bf16 )   (f32 accumulate)
# Grid = (M tiles, Cout tiles, K tiles);  K is the reduction axis (last).
# ----------------------------------------------------------------------------
def _convx_kernel(p_ref, w_ref, b_ref, o_ref, acc_ref):
    k = pl.program_id(2)

    @pl.when(k == 0)
    def _init():
        # Seed the accumulator with the folded BN bias so the finalize epilogue
        # is just ReLU + cast (no extra (TM, TN) VPU add on the output path).
        acc_ref[...] = jnp.broadcast_to(b_ref[...], acc_ref.shape)

    acc_ref[...] += jnp.dot(p_ref[...], w_ref[...],
                            preferred_element_type=jnp.float32)

    @pl.when(k == pl.num_programs(2) - 1)
    def _finalize():
        o_ref[...] = jnp.maximum(acc_ref[...], 0.0).astype(o_ref.dtype)


# ----------------------------------------------------------------------------
# Tile selection (review items: tight padding, big tiles, >=2 parallel tiles)
# ----------------------------------------------------------------------------
def _pick_n_tile(Np):
    # Wider Cout tiles cut the number of times the patch matrix is re-read
    # from HBM (the dominant byte term on v5e/v6e).
    if Np % 512 == 0 and Np >= 512:
        return 512
    if Np % 256 == 0:
        return 256
    return 128


def _pick_k_tile(Kp, max_tk=2048):
    if Kp <= max_tk:
        return Kp                      # single reduction step, zero K-tile waste
    tk = 128
    for cand in range(max_tk, 127, -128):
        if Kp % cand == 0:             # Kp is a multiple of 128, so this terminates
            tk = cand
            break
    return tk


def _pick_m_tiling(M, n_out_tiles, max_tm=1024):
    # Pick the tile COUNT first, then size tiles evenly -> padding waste <= 16*nt.
    nt = max(1, _cdiv(M, max_tm))
    # v7x has 2 TensorCores: make sure some "parallel" axis has >= 2 grid points.
    if nt == 1 and n_out_tiles == 1 and M >= 128:
        nt = 2
    tm = _round_up(_cdiv(M, nt), 16)
    return tm, nt * tm


def _fused_conv_matmul(patches_bf16, w_bf16, bias_f32, tm, tk, tn):
    """(Mp,Kp) bf16 @ (Kp,Np) bf16 + (1,Np) f32 bias, ReLU -> (Mp,Np) bf16."""
    Mp, Kp = patches_bf16.shape
    Np = w_bf16.shape[1]
    grid = (Mp // tm, Np // tn, Kp // tk)

    # Double-buffered working set (bf16 inputs + bf16 output) + f32 accumulator.
    vmem_bytes = (2 * tm * tk * 2 + 2 * tk * tn * 2 + 2 * tm * tn * 2
                  + tm * tn * 4 + 2 * tn * 4)
    vmem_limit = int(min(max(2 * vmem_bytes, 32 * 1024 * 1024),
                         48 * 1024 * 1024))      # headroom under v7x 64 MiB VMEM

    # If a trace on v5e/v6e still shows exposed patch DMA, set
    # pipeline_mode=pl.Buffered(3) on the patch BlockSpec below.
    return pl.pallas_call(
        _convx_kernel,
        out_shape=jax.ShapeDtypeStruct((Mp, Np), jnp.bfloat16),
        grid=grid,
        in_specs=[
            pl.BlockSpec((tm, tk), lambda i, j, k: (i, k)),   # im2col patch tile
            pl.BlockSpec((tk, tn), lambda i, j, k: (k, j)),   # folded weight tile
            pl.BlockSpec((1, tn), lambda i, j, k: (0, j)),    # folded BN bias
        ],
        out_specs=pl.BlockSpec((tm, tn), lambda i, j, k: (i, j)),
        scratch_shapes=[pltpu.VMEM((tm, tn), jnp.float32)],   # f32 accumulator
        compiler_params=pltpu.CompilerParams(
            dimension_semantics=("parallel", "parallel", "arbitrary"),
            vmem_limit_bytes=vmem_limit),
    )(patches_bf16, w_bf16, bias_f32)


# ----------------------------------------------------------------------------
# im2col patch extraction (NHWC, bf16), plain JAX layout glue.
# padding = k // 2 matches PyTorch Conv2d(padding=kernel // 2).
# ----------------------------------------------------------------------------
def _im2col(x, k, stride):
    N, H, W, C = x.shape
    pad = k // 2
    xp = jnp.pad(x, ((0, 0), (pad, pad), (pad, pad), (0, 0)))
    Ho = (H + 2 * pad - k) // stride + 1
    Wo = (W + 2 * pad - k) // stride + 1
    cols = []
    for kh in range(k):
        for kw in range(k):
            cols.append(xp[:, kh:kh + (Ho - 1) * stride + 1:stride,
                              kw:kw + (Wo - 1) * stride + 1:stride, :])
    patches = jnp.concatenate(cols, axis=-1).reshape(N * Ho * Wo, k * k * C)
    return patches, (N, Ho, Wo)


# ----------------------------------------------------------------------------
# ConvX forward: relu(bn(conv(x))) -- BN folded, NCHW in / NCHW out
# ----------------------------------------------------------------------------
def convx_forward(params, x_nchw, *, nchw_out=True):
    k, stride = params["k"], params["stride"]
    cout = params["cout"]
    w_bf16 = params["w_bf16"]          # (Kp, Np), BN scale folded, pre-padded bf16
    b_f32 = params["bias_padded"]      # (1, Np), folded BN shift, lane-padded f32
    Kp, Np = w_bf16.shape

    # NCHW -> NHWC (lane-dense channels) and cast to bf16 up front so the
    # im2col expansion only moves 2-byte elements through HBM.
    x = jnp.transpose(x_nchw, (0, 2, 3, 1)).astype(jnp.bfloat16)
    patches, (N, Ho, Wo) = _im2col(x, k, stride)
    M, K = patches.shape
    assert K <= Kp, (K, Kp)

    tn = _pick_n_tile(Np)
    tk = _pick_k_tile(Kp)
    tm, Mp = _pick_m_tiling(M, Np // tn)

    # Tight bf16 pad to the chosen tiling (fuses with the concat producer).
    patches = jnp.pad(patches, ((0, Mp - M), (0, Kp - K)))

    out = _fused_conv_matmul(patches, w_bf16, b_f32, tm, tk, tn)
    out = out[:M, :cout].reshape(N, Ho, Wo, cout)            # bf16, NHWC
    if not nchw_out:
        return out                     # channels-last consumers skip the transpose
    # NHWC -> NCHW at the module boundary; the transpose moves bf16 (half bytes),
    # the f32 cast happens on the final write to match the PyTorch output dtype.
    return jnp.transpose(out, (0, 3, 1, 2)).astype(jnp.float32)


# ----------------------------------------------------------------------------
# Deterministic parameter construction, BN folded (inference semantics).
# Padded bf16 weights / lane-padded bias are precomputed once here.
# ----------------------------------------------------------------------------
def make_convx_params(key, in_planes, out_planes, kernel=3, stride=1, eps=1e-5):
    k_w, k_g, k_b, k_m, k_v = jax.random.split(key, 5)
    fan_in = kernel * kernel * in_planes
    w = jax.random.normal(k_w, (kernel, kernel, in_planes, out_planes),
                          jnp.float32) * np.sqrt(2.0 / fan_in)
    gamma = 1.0 + 0.1 * jax.random.normal(k_g, (out_planes,), jnp.float32)
    beta = 0.1 * jax.random.normal(k_b, (out_planes,), jnp.float32)
    mean = 0.1 * jax.random.normal(k_m, (out_planes,), jnp.float32)
    var = 0.9 + 0.2 * jax.random.uniform(k_v, (out_planes,), jnp.float32)

    scale = gamma / jnp.sqrt(var + eps)          # BN folded into conv weights
    w_folded = w * scale                         # per-out-channel scale
    bias = beta - mean * scale                   # per-out-channel shift

    K = kernel * kernel * in_planes
    Kp = _round_up(K, 128)
    Np = _round_up(out_planes, 128)
    w_bf16 = jnp.pad(w_folded.reshape(K, out_planes),
                     ((0, Kp - K), (0, Np - out_planes))).astype(jnp.bfloat16)
    bias_padded = jnp.pad(bias, (0, Np - out_planes)).reshape(1, Np)

    return {
        "w": w_folded, "bias": bias,                         # f32 (reference use)
        "w_bf16": w_bf16,
        "bias_padded": bias_padded.astype(jnp.float32),
        "k": kernel, "stride": stride,
        "cin": in_planes, "cout": out_planes,
    }


if __name__ == "__main__":
    key = jax.random.PRNGKey(0)
    kp, kx, kp2, kx2 = jax.random.split(key, 4)

    def _reference(p, xin, stride):
        w_oihw = jnp.transpose(p["w"], (3, 2, 0, 1))
        pad = p["k"] // 2
        r = jax.lax.conv_general_dilated(
            xin, w_oihw, window_strides=(stride, stride),
            padding=((pad, pad), (pad, pad)),
            dimension_numbers=("NCHW", "OIHW", "NCHW"))
        return jnp.maximum(r + p["bias"][None, :, None, None], 0.0)

    # Primary check: ConvX(4 -> 32, kernel=3, stride=1) on (2, 4, 16, 16).
    params = make_convx_params(kp, in_planes=4, out_planes=32, kernel=3, stride=1)
    x = jax.random.normal(kx, (2, 4, 16, 16), jnp.float32)

    fwd = jax.jit(functools.partial(convx_forward, params))
    out = jax.block_until_ready(fwd(x))

    assert out.shape == (2, 32, 16, 16), out.shape
    assert bool(jnp.all(jnp.isfinite(out)))
    assert bool(jnp.all(out >= 0.0))             # ReLU output

    ref = _reference(params, x, 1)
    max_err = float(jnp.max(jnp.abs(out - ref)))
    assert max_err < 0.25, f"max abs error vs reference: {max_err}"  # bf16 tol

    # Secondary check: stride-2 path with a non-multiple-of-128 Cout.
    params2 = make_convx_params(kp2, in_planes=8, out_planes=24, kernel=3, stride=2)
    x2 = jax.random.normal(kx2, (2, 8, 16, 16), jnp.float32)
    out2 = jax.block_until_ready(
        jax.jit(functools.partial(convx_forward, params2))(x2))
    assert out2.shape == (2, 24, 8, 8), out2.shape
    ref2 = _reference(params2, x2, 2)
    max_err2 = float(jnp.max(jnp.abs(out2 - ref2)))
    assert max_err2 < 0.25, f"max abs error vs reference (stride 2): {max_err2}"

    print("KERNEL_OK")
</pallas_src>

<mosaic_0001>
module attributes {stable_mosaic.version = 11 : i64} {
  func.func @_convx_kernel(%arg0: i32, %arg1: i32, %arg2: i32, %arg3: memref<256x128xbf16, #tpu.memory_space<vmem>>, %arg4: memref<128x128xbf16, #tpu.memory_space<vmem>>, %arg5: memref<1x128xf32, #tpu.memory_space<vmem>>, %arg6: memref<256x128xbf16, #tpu.memory_space<vmem>>, %arg7: memref<256x128xf32, #tpu.memory_space<vmem>>) attributes {dimension_semantics = [#tpu.dimension_semantics<parallel>, #tpu.dimension_semantics<parallel>, #tpu.dimension_semantics<arbitrary>], iteration_bounds = array<i64: 2, 1, 1>, scalar_prefetch = 0 : i64, scratch_operands = 1 : i64, tpu.core_type = #tpu.core_type<tc>, window_params = [{transform_indices = @transform_0, window_bounds = array<i64: 256, 128>}, {transform_indices = @transform_1, window_bounds = array<i64: 128, 128>}, {transform_indices = @transform_2, window_bounds = array<i64: 1, 128>}, {transform_indices = @transform_3, window_bounds = array<i64: 256, 128>}]} {
    %c0_i32 = arith.constant 0 : i32
    %0 = arith.cmpi eq, %arg2, %c0_i32 : i32
    %1 = arith.extui %0 : i1 to i32
    %c0_i32_0 = arith.constant 0 : i32
    %2 = arith.cmpi ne, %1, %c0_i32_0 : i32
    scf.if %2 {
      %c0_10 = arith.constant 0 : index
      %c0_11 = arith.constant 0 : index
      %12 = vector.load %arg5[%c0_10, %c0_11] : memref<1x128xf32, #tpu.memory_space<vmem>>, vector<1x128xf32>
      %13 = vector.shape_cast %12 : vector<1x128xf32> to vector<1x128xf32>
      %14 = vector.broadcast %13 : vector<1x128xf32> to vector<256x128xf32>
      %c0_12 = arith.constant 0 : index
      %c0_13 = arith.constant 0 : index
      %15 = vector.load %arg7[%c0_12, %c0_13] : memref<256x128xf32, #tpu.memory_space<vmem>>, vector<256x128xf32>
      tpu.vector_store %arg7[%c0_12, %c0_13], %14 {strides = array<i32>} : memref<256x128xf32, #tpu.memory_space<vmem>>, vector<256x128xf32>,
    } else {
    }
    %c0 = arith.constant 0 : index
    %c0_1 = arith.constant 0 : index
    %3 = vector.load %arg7[%c0, %c0_1] : memref<256x128xf32, #tpu.memory_space<vmem>>, vector<256x128xf32>
    %c0_2 = arith.constant 0 : index
    %c0_3 = arith.constant 0 : index
    %4 = vector.load %arg3[%c0_2, %c0_3] : memref<256x128xbf16, #tpu.memory_space<vmem>>, vector<256x128xbf16>
    %c0_4 = arith.constant 0 : index
    %c0_5 = arith.constant 0 : index
    %5 = vector.load %arg4[%c0_4, %c0_5] : memref<128x128xbf16, #tpu.memory_space<vmem>>, vector<128x128xbf16>
    %cst = arith.constant dense<0.000000e+00> : vector<256x128xf32>
    %6 = tpu.matmul %4, %5, %cst {dimension_numbers = #tpu.dot_dimension_numbers<[1], [0], [0], [1], [0, 0, 1, 1], [], []>} : vector<256x128xbf16>, vector<128x128xbf16>, vector<256x128xf32> -> vector<256x128xf32>
    %7 = arith.addf %3, %6 : vector<256x128xf32>
    %c0_6 = arith.constant 0 : index
    %c0_7 = arith.constant 0 : index
    %8 = vector.load %arg7[%c0_6, %c0_7] : memref<256x128xf32, #tpu.memory_space<vmem>>, vector<256x128xf32>
    tpu.vector_store %arg7[%c0_6, %c0_7], %7 {strides = array<i32>} : memref<256x128xf32, #tpu.memory_space<vmem>>, vector<256x128xf32>,
    %c0_i32_8 = arith.constant 0 : i32
    %9 = arith.cmpi eq, %arg2, %c0_i32_8 : i32
    %10 = arith.extui %9 : i1 to i32
    %c0_i32_9 = arith.constant 0 : i32
    %11 = arith.cmpi ne, %10, %c0_i32_9 : i32
    scf.if %11 {
      %c0_10 = arith.constant 0 : index
      %c0_11 = arith.constant 0 : index
      %12 = vector.load %arg7[%c0_10, %c0_11] : memref<256x128xf32, #tpu.memory_space<vmem>>, vector<256x128xf32>
      %cst_12 = arith.constant 0.000000e+00 : f32
      %13 = vector.broadcast %cst_12 : f32 to vector<256x128xf32>
      %14 = arith.maximumf %12, %13 : vector<256x128xf32>
      %15 = arith.truncf %14 : vector<256x128xf32> to vector<256x128xbf16>
      %c0_13 = arith.constant 0 : index
      %c0_14 = arith.constant 0 : index
      %16 = vector.load %arg6[%c0_13, %c0_14] : memref<256x128xbf16, #tpu.memory_space<vmem>>, vector<256x128xbf16>
      tpu.vector_store %arg6[%c0_13, %c0_14], %15 {strides = array<i32>} : memref<256x128xbf16, #tpu.memory_space<vmem>>, vector<256x128xbf16>,
    } else {
    }
    return
  }
  func.func @transform_0(%arg0: i32, %arg1: i32, %arg2: i32) -> (i32, i32) {
    %c0_i32 = arith.constant 0 : i32
    return %arg0, %arg2 : i32, i32
  }
  func.func @transform_1(%arg0: i32, %arg1: i32, %arg2: i32) -> (i32, i32) {
    %c0_i32 = arith.constant 0 : i32
    return %arg2, %arg1 : i32, i32
  }
  func.func @transform_2(%arg0: i32, %arg1: i32, %arg2: i32) -> (i32, i32) {
    %c0_i32 = arith.constant 0 : i32
    %c0_i32_0 = arith.constant 0 : i32
    return %c0_i32, %arg1 : i32, i32
  }
  func.func @transform_3(%arg0: i32, %arg1: i32, %arg2: i32) -> (i32, i32) {
    %c0_i32 = arith.constant 0 : i32
    return %arg0, %arg1 : i32, i32
  }
}

</mosaic_0001>

<bundles_post_ra>
// kernel: convx_forward.1
= control target key start
LH: loop header
LB: loop body
LE: loop exit
PB: predicated region body
PF: predicated region fallthrough
CT: control target
= control target key end

     0   :  { %s1467_s12 = smov 0   ;;  %s1469_s13 = smov 0   ;;  %s1604_s0 = inlined_call_operand.vmem [shape: bf16[512,128], index: 0, kind: input, shape index: {}]   ;;  %s1605_s1 = inlined_call_operand.vmem [shape: bf16[128,128], index: 1, kind: input, shape index: {}]   ;;  %s1606_s2 = inlined_call_operand.vmem [shape: f32[1,128], index: 2, kind: input, shape index: {}]   ;;  %s1607_s3 = inlined_call_operand.vmem [shape: bf16[512,128], index: 3, kind: output, shape index: {}]  }
   0x1   :  { %s1471_s14 = smov 0  }
   0x2 LB: > { %s32_s15 = sadd.s32 1, %s1441_s13  ;;  %p1096_p0 = scmp.ge.s32.totalorder %s1445_s14, 1  ;;  %s1445_s14 = sphi %s1471_s14, %s13_s14   ;;  %s1441_s13 = sphi %s1469_s13, %s1609_s13   ;;  %s1437_s12 = sphi %s1467_s12, %s1608_s12  }
   0x3   : > { %p34_p1 = scmp.ge.s32.totalorder %s32_s15, 2  ;;  %p188_p2 = scmp.lt.s32.totalorder %s1445_s14, 3 }
   0x5   : > { %s1611_s15 = smov (%p34_p1, %s32_s15), 0  ;;  %p189_p3 = pnand %p1096_p0, %p188_p2 }
   0x6   : > { %s1097_s18 = sshll.u32 (!%p189_p3), %s1437_s12, 5 }
   0x7   : > { %192 = sbr.rel (%p189_p3) target bundleno = 275 (0x113), region = 32  ;;  %p230_p4 = scmp.lt.s32.totalorder (!%p189_p3), %s1097_s18, 63 }
   0xc   : > { %v1399_v0 = vld [vmem:[%s1605_s1 + $0x38] sm:$0xff]   ;;  %v1400_v1 = vld [vmem:[%s1605_s1 + $0x30] sm:$0xff]   ;;  %s1613_s18 = smov (!%p230_p4, %s1097_s18), 63  ;;  %v1401_v2 = vld [vmem:[%s1605_s1 + $0x28] sm:$0xff]  }
   0xd   : > { %1311 = vmatprep.subr.bf16.mxu0 %v1399_v0  ;;  %1359 = vmatprep.subr.bf16.mxu1 %v1399_v0  ;;  %s1098_s23 = sshll.u32 %s1613_s18, 2  ;;  %v1402_v3 = vld [vmem:[%s1605_s1 + $0x20] sm:$0xff]   ;;  %v1403_v6 = vld [vmem:[%s1605_s1 + $0x18] sm:$0xff]   ;;  %v1404_v7 = vld [vmem:[%s1605_s1 + $0x10] sm:$0xff]  }
   0xe   : > { %1312 = vmatpush3.bf16.msra.mxu0 %v1399_v0  ;;  %1367 = vmatpush3.bf16.msra.mxu1 %v1399_v0  ;;  %s1502_s26 = scalar_lea.vmem %s1604_s0, %s1098_s23  ;;  %v1405_v8 = vld [vmem:[%s1605_s1 + $0x8] sm:$0xff]   ;;  %v1406_v9 = vld [vmem:[%s1605_s1] sm:$0xff]   ;;  %s1553_s17 = scalar_lea.vmem %s1607_s3, %s1098_s23 }
   0xf   : > { %1313 = vmatprep.subr.bf16.mxu0 %v1400_v1  ;;  %1360 = vmatprep.subr.bf16.mxu1 %v1400_v1  ;;  %v1407_v4 = vld [vmem:[%s1502_s26] sm:$0xff]   ;;  %v1409_v10 = vld [vmem:[%s1502_s26 + $0x8] sm:$0xff]   ;;  %v1411_v12 = vld [vmem:[%s1502_s26 + $0x10] sm:$0xff]  }
  0x10   : > { %v1408_v5 = vld [vmem:[%s1502_s26 + $0x40] sm:$0xff]   ;;  %1327 = vmatprep.mubr.bf16.mxu0 %v1407_v4  ;;  %v1410_v11 = vld [vmem:[%s1502_s26 + $0x48] sm:$0xff]   ;;  %v1412_v13 = vld [vmem:[%s1502_s26 + $0x50] sm:$0xff]  }
  0x11   : > { %1343 = vmatprep.mubr.bf16.mxu1 %v1408_v5  ;;  %v1413_v14 = vld [vmem:[%s1502_s26 + $0x18] sm:$0xff]   ;;  %v1415_v16 = vld [vmem:[%s1502_s26 + $0x20] sm:$0xff]   ;;  %v1417_v18 = vld [vmem:[%s1502_s26 + $0x28] sm:$0xff]  }
  0x12   : > { %1314 = vmatpush3.bf16.msra.mxu0 %v1400_v1  ;;  %1368 = vmatpush3.bf16.msra.mxu1 %v1400_v1  ;;  %v1414_v15 = vld [vmem:[%s1502_s26 + $0x58] sm:$0xff]   ;;  %v1416_v17 = vld [vmem:[%s1502_s26 + $0x60] sm:$0xff]   ;;  %v1418_v19 = vld [vmem:[%s1502_s26 + $0x68] sm:$0xff]  }
  0x13   : > { %1315 = vmatprep.subr.bf16.mxu0 %v1401_v2  ;;  %1361 = vmatprep.subr.bf16.mxu1 %v1401_v2  ;;  %v1419_v20 = vld [vmem:[%s1502_s26 + $0x30] sm:$0xff]   ;;  %v1421_v22 = vld [vmem:[%s1502_s26 + $0x38] sm:$0xff]   ;;  %v1538_v24 = vld [vmem:[%s1606_s2] ss:$0 sm:$0xff] }
  0x14   : > { %v1420_v21 = vld [vmem:[%s1502_s26 + $0x70] sm:$0xff]   ;;  %v1422_v23 = vld [vmem:[%s1502_s26 + $0x78] sm:$0xff]  }
  0x16   : > { %1316 = vmatpush3.bf16.msra.mxu0 %v1401_v2  ;;  %1369 = vmatpush3.bf16.msra.mxu1 %v1401_v2 }
  0x17   : > { %1317 = vmatprep.subr.bf16.mxu0 %v1402_v3  ;;  %1362 = vmatprep.subr.bf16.mxu1 %v1402_v3 }
  0x1a   : > { %1318 = vmatpush3.bf16.msra.mxu0 %v1402_v3  ;;  %1370 = vmatpush3.bf16.msra.mxu1 %v1402_v3 }
  0x1b   : > { %1319 = vmatprep.subr.bf16.mxu0 %v1403_v6  ;;  %1363 = vmatprep.subr.bf16.mxu1 %v1403_v6 }
  0x1e   : > { %1320 = vmatpush3.bf16.msra.mxu0 %v1403_v6  ;;  %1371 = vmatpush3.bf16.msra.mxu1 %v1403_v6 }
  0x1f   : > { %1321 = vmatprep.subr.bf16.mxu0 %v1404_v7  ;;  %1364 = vmatprep.subr.bf16.mxu1 %v1404_v7 }
  0x22   : > { %1322 = vmatpush3.bf16.msra.mxu0 %v1404_v7  ;;  %1372 = vmatpush3.bf16.msra.mxu1 %v1404_v7 }
  0x23   : > { %1323 = vmatprep.subr.bf16.mxu0 %v1405_v8  ;;  %1365 = vmatprep.subr.bf16.mxu1 %v1405_v8 }
  0x26   : > { %1324 = vmatpush3.bf16.msra.mxu0 %v1405_v8  ;;  %1373 = vmatpush3.bf16.msra.mxu1 %v1405_v8 }
  0x27   : > { %1325 = vmatprep.subr.bf16.mxu0 %v1406_v9  ;;  %1366 = vmatprep.subr.bf16.mxu1 %v1406_v9 }
  0x2a   : > { %1326 = vmatpush3.bf16.msra.mxu0 %v1406_v9  ;;  %1374 = vmatpush3.bf16.msra.mxu1 %v1406_v9 }
  0x2d   : > { %1328 = vmatmul.mubr.bf16.vlgmr.msra.gmra.mxu0 %v1409_v10  ;;  %1344 = vmatmul.mubr.bf16.vlgmr.msra.gmra.mxu1 %v1410_v11 }
  0x2e   : > { %1331 = vmatprep.mubr.bf16.mxu0 %v1411_v12  ;;  %1347 = vmatprep.mubr.bf16.mxu1 %v1412_v13 }
  0x35   : > { %1332 = vmatmul.mubr.bf16.gmra.mxu0 %v1413_v14  ;;  %1348 = vmatmul.mubr.bf16.gmra.mxu1 %v1414_v15 }
  0x36   : > { %1335 = vmatprep.mubr.bf16.mxu0 %v1415_v16  ;;  %1351 = vmatprep.mubr.bf16.mxu1 %v1416_v17 }
  0x3d   : > { %1336 = vmatmul.mubr.bf16.gmra.mxu0 %v1417_v18  ;;  %1352 = vmatmul.mubr.bf16.gmra.mxu1 %v1418_v19 }
  0x3e   : > { %1339 = vmatprep.mubr.bf16.mxu0 %v1419_v20  ;;  %1355 = vmatprep.mubr.bf16.mxu1 %v1420_v21 }
  0x45   : > { %1340 = vmatmul.mubr.bf16.gmra.mxu0 %v1421_v22  ;;  %1356 = vmatmul.mubr.bf16.gmra.mxu1 %v1422_v23 }
  0xed   : > { %v1329_v25 = vpop.f32.mrf.mxu0  ;;  %v1345_v26 = vpop.f32.mrf.mxu1 }
  0xee   : > { %v690_v27 = vadd.f32 %v1329_v25, %v1538_v24  ;;  %v706_v28 = vadd.f32 %v1345_v26, %v1538_v24 }
  0xef   : > { %v561_v29 = vpop.f32.mrf.mxu0  ;;  %v625_v30 = vpop.f32.mrf.mxu1 }
  0xf0   : > { %v688_v31 = vadd.f32 %v1538_v24, %v561_v29  ;;  %v704_v32 = vadd.f32 %v1538_v24, %v625_v30  ;;  %v789_v37 = vmax.f32 %v690_v27, 0.0  ;;  %v805_v38 = vmax.f32 %v706_v28, 0.0 }
  0xf1   : > { %v1330_v33 = vpop.f32.mrf.mxu0  ;;  %v1346_v34 = vpop.f32.mrf.mxu1 }
  0xf2   : > { %v691_v35 = vadd.f32 %v1330_v33, %v1538_v24  ;;  %v707_v36 = vadd.f32 %v1346_v34, %v1538_v24  ;;  %v787_v45 = vmax.f32 %v688_v31, 0.0  ;;  %v803_v46 = vmax.f32 %v704_v32, 0.0 }
  0xf3   : > { %v564_v39 = vpop.f32.mrf.mxu0  ;;  %v628_v40 = vpop.f32.mrf.mxu1 }
  0xf4   : > { %v790_v41 = vmax.f32 %v691_v35, 0.0  ;;  %v806_v42 = vmax.f32 %v707_v36, 0.0  ;;  %v689_v43 = vadd.f32 %v1538_v24, %v564_v39  ;;  %v705_v44 = vadd.f32 %v1538_v24, %v628_v40 }
  0xf5   : > { %v1333_v47 = vpop.f32.mrf.mxu0  ;;  %v1349_v48 = vpop.f32.mrf.mxu1 }
  0xf6   : > { %v1200_v49 = vpack.c.bf16 %v790_v41, %v789_v37  ;;  %v1240_v50 = vpack.c.bf16 %v806_v42, %v805_v38  ;;  %v788_v51 = vmax.f32 %v689_v43, 0.0  ;;  %v804_v52 = vmax.f32 %v705_v44, 0.0 }
  0xf7   : > { %v694_v53 = vadd.f32 %v1333_v47, %v1538_v24  ;;  %v710_v54 = vadd.f32 %v1349_v48, %v1538_v24  ;;  %v577_v55 = vpop.f32.mrf.mxu0  ;;  %v641_v56 = vpop.f32.mrf.mxu1 }
  0xf8   : > { %1272 = vst [vmem:[%s1553_s17 + $0x8] sm:$0xff] %v1200_v49   ;;  %1280 = vst [vmem:[%s1553_s17 + $0x48] sm:$0xff] %v1240_v50   ;;  %v1195_v57 = vpack.c.bf16 %v788_v51, %v787_v45  ;;  %v1235_v58 = vpack.c.bf16 %v804_v52, %v803_v46  ;;  %v692_v59 = vadd.f32 %v1538_v24, %v577_v55 }
  0xf9   : > { %v708_v60 = vadd.f32 %v1538_v24, %v641_v56  ;;  %v1334_v61 = vpop.f32.mrf.mxu0  ;;  %v1350_v62 = vpop.f32.mrf.mxu1  ;;  %v793_v1 = vmax.f32 %v694_v53, 0.0  ;;  %v809_v2 = vmax.f32 %v710_v54, 0.0 }
  0xfa   : > { %1196 = vst [vmem:[%s1553_s17] sm:$0xff] %v1195_v57   ;;  %1279 = vst [vmem:[%s1553_s17 + $0x40] sm:$0xff] %v1235_v58   ;;  %v695_v63 = vadd.f32 %v1334_v61, %v1538_v24  ;;  %v711_v0 = vadd.f32 %v1350_v62, %v1538_v24  ;;  %v791_v9 = vmax.f32 %v692_v59, 0.0 }
  0xfb   : > { %v580_v3 = vpop.f32.mrf.mxu0  ;;  %v644_v4 = vpop.f32.mrf.mxu1  ;;  %v807_v10 = vmax.f32 %v708_v60, 0.0 }
  0xfc   : > { %v794_v5 = vmax.f32 %v695_v63, 0.0  ;;  %v810_v6 = vmax.f32 %v711_v0, 0.0  ;;  %v693_v7 = vadd.f32 %v1538_v24, %v580_v3  ;;  %v709_v8 = vadd.f32 %v1538_v24, %v644_v4 }
  0xfd   : > { %v1337_v11 = vpop.f32.mrf.mxu0  ;;  %v1353_v12 = vpop.f32.mrf.mxu1 }
  0xfe   : > { %v1210_v13 = vpack.c.bf16 %v794_v5, %v793_v1  ;;  %v1250_v14 = vpack.c.bf16 %v810_v6, %v809_v2  ;;  %v792_v15 = vmax.f32 %v693_v7, 0.0  ;;  %v808_v16 = vmax.f32 %v709_v8, 0.0 }
  0xff   : > { %v698_v17 = vadd.f32 %v1337_v11, %v1538_v24  ;;  %v714_v18 = vadd.f32 %v1353_v12, %v1538_v24  ;;  %v593_v19 = vpop.f32.mrf.mxu0  ;;  %v657_v20 = vpop.f32.mrf.mxu1 }
 0x100   : > { %1274 = vst [vmem:[%s1553_s17 + $0x18] sm:$0xff] %v1210_v13   ;;  %1282 = vst [vmem:[%s1553_s17 + $0x58] sm:$0xff] %v1250_v14   ;;  %v1205_v21 = vpack.c.bf16 %v792_v15, %v791_v9  ;;  %v1245_v22 = vpack.c.bf16 %v808_v16, %v807_v10  ;;  %v696_v23 = vadd.f32 %v1538_v24, %v593_v19 }
 0x101   : > { %v712_v25 = vadd.f32 %v1538_v24, %v657_v20  ;;  %v1338_v26 = vpop.f32.mrf.mxu0  ;;  %v1354_v27 = vpop.f32.mrf.mxu1  ;;  %v797_v30 = vmax.f32 %v698_v17, 0.0  ;;  %v813_v31 = vmax.f32 %v714_v18, 0.0 }
 0x102   : > { %1273 = vst [vmem:[%s1553_s17 + $0x10] sm:$0xff] %v1205_v21   ;;  %1281 = vst [vmem:[%s1553_s17 + $0x50] sm:$0xff] %v1245_v22   ;;  %v699_v28 = vadd.f32 %v1338_v26, %v1538_v24  ;;  %v715_v29 = vadd.f32 %v1354_v27, %v1538_v24  ;;  %v795_v38 = vmax.f32 %v696_v23, 0.0 }
 0x103   : > { %v596_v32 = vpop.f32.mrf.mxu0  ;;  %v660_v33 = vpop.f32.mrf.mxu1  ;;  %v811_v39 = vmax.f32 %v712_v25, 0.0 }
 0x104   : > { %v798_v34 = vmax.f32 %v699_v28, 0.0  ;;  %v814_v35 = vmax.f32 %v715_v29, 0.0  ;;  %v697_v36 = vadd.f32 %v1538_v24, %v596_v32  ;;  %v713_v37 = vadd.f32 %v1538_v24, %v660_v33 }
 0x105   : > { %v1341_v40 = vpop.f32.mrf.mxu0  ;;  %v1357_v41 = vpop.f32.mrf.mxu1 }
 0x106   : > { %v1220_v42 = vpack.c.bf16 %v798_v34, %v797_v30  ;;  %v1260_v43 = vpack.c.bf16 %v814_v35, %v813_v31  ;;  %v796_v44 = vmax.f32 %v697_v36, 0.0  ;;  %v812_v45 = vmax.f32 %v713_v37, 0.0 }
 0x107   : > { %v702_v46 = vadd.f32 %v1341_v40, %v1538_v24  ;;  %v718_v47 = vadd.f32 %v1357_v41, %v1538_v24  ;;  %v609_v48 = vpop.f32.mrf.mxu0  ;;  %v673_v49 = vpop.f32.mrf.mxu1 }
 0x108   : > { %1276 = vst [vmem:[%s1553_s17 + $0x28] sm:$0xff] %v1220_v42   ;;  %1284 = vst [vmem:[%s1553_s17 + $0x68] sm:$0xff] %v1260_v43   ;;  %v1215_v50 = vpack.c.bf16 %v796_v44, %v795_v38  ;;  %v1255_v51 = vpack.c.bf16 %v812_v45, %v811_v39  ;;  %v700_v52 = vadd.f32 %v1538_v24, %v609_v48 }
 0x109   : > { %v716_v53 = vadd.f32 %v1538_v24, %v673_v49  ;;  %v1342_v54 = vpop.f32.mrf.mxu0  ;;  %v1358_v55 = vpop.f32.mrf.mxu1  ;;  %v801_v58 = vmax.f32 %v702_v46, 0.0  ;;  %v817_v59 = vmax.f32 %v718_v47, 0.0 }
 0x10a   : > { %1275 = vst [vmem:[%s1553_s17 + $0x20] sm:$0xff] %v1215_v50   ;;  %1283 = vst [vmem:[%s1553_s17 + $0x60] sm:$0xff] %v1255_v51   ;;  %v703_v56 = vadd.f32 %v1342_v54, %v1538_v24  ;;  %v719_v57 = vadd.f32 %v1358_v55, %v1538_v24  ;;  %v799_v2 = vmax.f32 %v700_v52, 0.0 }
 0x10b   : > { %v612_v60 = vpop.f32.mrf.mxu0  ;;  %v676_v61 = vpop.f32.mrf.mxu1  ;;  %v815_v3 = vmax.f32 %v716_v53, 0.0 }
 0x10c   : > { %v802_v62 = vmax.f32 %v703_v56, 0.0  ;;  %v818_v63 = vmax.f32 %v719_v57, 0.0  ;;  %v701_v0 = vadd.f32 %v1538_v24, %v612_v60  ;;  %v717_v1 = vadd.f32 %v1538_v24, %v676_v61 }
 0x10e   : > { %v1230_v4 = vpack.c.bf16 %v802_v62, %v801_v58  ;;  %v1270_v5 = vpack.c.bf16 %v818_v63, %v817_v59  ;;  %v800_v6 = vmax.f32 %v701_v0, 0.0  ;;  %v816_v7 = vmax.f32 %v717_v1, 0.0 }
 0x110   : > { %1278 = vst [vmem:[%s1553_s17 + $0x38] sm:$0xff] %v1230_v4   ;;  %1286 = vst [vmem:[%s1553_s17 + $0x78] sm:$0xff] %v1270_v5   ;;  %v1225_v8 = vpack.c.bf16 %v800_v6, %v799_v2  ;;  %v1265_v9 = vpack.c.bf16 %v816_v7, %v815_v3 }
 0x112   : > { %1277 = vst [vmem:[%s1553_s17 + $0x30] sm:$0xff] %v1225_v8   ;;  %1285 = vst [vmem:[%s1553_s17 + $0x70] sm:$0xff] %v1265_v9  }
 0x113 PF: > { %s13_s14 = sadd.s32 1, %s1445_s14   ;;  %s1608_s12 = smov %s1441_s13 }
 0x114   : > { %p10_p5 = scmp.ge.s32.totalorder %s13_s14, 4   ;;  %s1609_s13 = smov %s1611_s15 }
 0x116   :  { %12 = sbr.rel (!%p10_p5) target bundleno = 2 (0x2), region = 76 }

</bundles_post_ra>
